<compile_context>
chip_gen: v5e
topology: v5e:2x2
jax: 0.10.0
libtpu: 0.0.40
codegen_flags: <defaults>
</compile_context>

<pallas_src>
import numpy as np

import jax
import jax.numpy as jnp
from jax import lax
from jax.experimental import pallas as pl
from jax.experimental.pallas import tpu as pltpu

SUBLANES = 8     # sublane granularity; K is padded up to a multiple of this
BIG = 1e30       # finite stand-in for +inf in the DP (no inf/NaN corner cases)
# NOTE: sentinel cells keep accumulating local costs each step; f32 headroom
# (~3.4e38) is ample for normal-magnitude inputs.


def _pick_lane_width(B: int, L: int) -> int:
    """Batch-tile lane width: widen for large B, keep >=2 tiles (v7x megacore),
    and cap so the double-buffered (L, W) x block stays well inside VMEM
    (v7x only has 64 MiB physical / 32 MiB default scoped)."""
    if B >= 1024:
        w = 512
    elif B >= 512:
        w = 256
    else:
        w = 128
    while w > 128 and 2 * L * w * 4 > (24 << 20):
        w //= 2
    # TODO(synk): for extremely long L where even W=128 blows VMEM, stream L in
    # chunks via pltpu.emit_pipeline carrying the two diagonals in scratch.
    return w


def _make_dtw_wavefront_kernel(K: int, L: int, K_pad: int, W: int):
    """Build a wavefront-DTW kernel specialized to static (K, L, K_pad, W)."""
    n_diag = K + L - 1
    n_steps = n_diag - 1
    # Fully unroll short wavefronts; partially unroll long ones so the LLO
    # scheduler can hide roll latency and amortize loop overhead.
    unroll = True if n_steps <= 32 else 16

    def kernel(kcol_ref, x_ref, o_ref):
        # kcol_ref: (K_pad, W) f32  template, k[i] broadcast across lanes
        # x_ref   : (L, W)     f32  inputs, batch on lanes
        # o_ref   : (1, W)     f32  per-batch DTW distance C[K-1, L-1]
        kcol = kcol_ref[...]
        row_idx = lax.broadcasted_iota(jnp.int32, (K_pad, W), 0)
        row0 = row_idx == 0
        # Hoisted loop-invariant vector constant (not re-splatted per step).
        big_full = jnp.full((K_pad, W), BIG, jnp.float32)

        def shift_down(v, fill):
            # out[0] = fill, out[i] = v[i-1] for i >= 1.  Single XLU roll.
            return jnp.where(row0, fill, pltpu.roll(v, shift=1, axis=0))

        # Diagonal d stores C[i, d - i] on sublane i; invalid cells hold BIG.
        # xwin[i] = x[d - i] is the matching anti-diagonal slice of the input.
        x0 = x_ref[pl.ds(0, 1), :]                          # (1, W)
        xwin = jnp.where(row0, x0, 0.0)                     # (K_pad, W)
        prev = jnp.where(row0, (kcol - xwin) ** 2, big_full)  # diagonal 0
        sh_prev2 = big_full   # shift_down(diagonal d-2); all BIG for d = 1

        def step(d, carry):
            prev, sh_prev2, xwin = carry
            # Issue the x row load first so it runs ahead of the dependent
            # min/add chain.  j_src clamp: cells with j >= L take finite
            # values but can never feed C[K-1, L-1] (dependencies never
            # decrease j), so the result is unaffected.
            j_src = jnp.minimum(d, L - 1)
            x_new = x_ref[pl.ds(j_src, 1), :]
            # Slide the x anti-diagonal: xwin'[i] = xwin[i-1], xwin'[0] = x[d].
            xwin = shift_down(xwin, x_new)

            cost = (kcol - xwin) ** 2          # D[i, d - i]
            # C[i,j] = D[i,j] + min(C[i,j-1], C[i-1,j], C[i-1,j-1])
            #        = cost   + min(prev[i],  prev[i-1], prev2[i-1])
            # shift_down(prev2) == previous step's shift_down(prev): carried.
            sh_prev = shift_down(prev, big_full)
            best = jnp.minimum(jnp.minimum(prev, sh_prev), sh_prev2)
            return (cost + best, sh_prev, xwin)

        prev, _, _ = lax.fori_loop(
            1, n_diag, step, (prev, sh_prev2, xwin), unroll=unroll)

        # Last diagonal (d = K + L - 2): C[K-1, L-1] lives on sublane K-1.
        # Masked cross-sublane sum extracts it straight from registers
        # (no VMEM scratch round-trip).
        o_ref[...] = jnp.sum(jnp.where(row_idx == (K - 1), prev, 0.0),
                             axis=0, keepdims=True)

    return kernel


def dtw_forward(template, x):
    """template: (K,) learned DTW kernel; x: (B, L) batch -> (B,) DTW dists."""
    template = jnp.asarray(template, jnp.float32)
    x = jnp.asarray(x, jnp.float32)
    K = int(template.shape[0])
    B, L = (int(s) for s in x.shape)

    K_pad = max(SUBLANES, ((K + SUBLANES - 1) // SUBLANES) * SUBLANES)
    W = _pick_lane_width(B, L)
    n_btiles = (B + W - 1) // W
    B_pad = n_btiles * W

    # Layout plumbing only: batch -> lanes, sequence -> sublanes, template
    # broadcast across lanes so every wavefront step is a full (K_pad, W) op.
    x_pad = jnp.zeros((L, B_pad), jnp.float32).at[:, :B].set(x.T)
    kcol = jnp.zeros((K_pad, W), jnp.float32).at[:K, :].set(
        jnp.broadcast_to(template[:, None], (K, W)))

    out = pl.pallas_call(
        _make_dtw_wavefront_kernel(K, L, K_pad, W),
        out_shape=jax.ShapeDtypeStruct((1, B_pad), jnp.float32),
        grid=(n_btiles,),
        in_specs=[
            pl.BlockSpec((K_pad, W), lambda b: (0, 0)),  # template (shared)
            pl.BlockSpec((L, W), lambda b: (0, b)),      # x batch tile
        ],
        out_specs=pl.BlockSpec((1, W), lambda b: (0, b)),
        compiler_params=pltpu.CompilerParams(
            dimension_semantics=("parallel",)),
    )(kcol, x_pad)

    return out[0, :B]


def _dtw_reference(template, x):
    """Pure-numpy reference DP for validation."""
    k = np.asarray(template, np.float64)
    xs = np.asarray(x, np.float64)
    K = k.shape[0]
    B, L = xs.shape
    out = np.zeros((B,), np.float64)
    for b in range(B):
        D = (k[:, None] - xs[b][None, :]) ** 2
        C = np.full((K, L), np.inf)
        C[0, 0] = D[0, 0]
        for j in range(1, L):
            C[0, j] = C[0, j - 1] + D[0, j]
        for i in range(1, K):
            C[i, 0] = C[i - 1, 0] + D[i, 0]
            for j in range(1, L):
                C[i, j] = D[i, j] + min(C[i - 1, j], C[i - 1, j - 1], C[i, j - 1])
        out[b] = C[K - 1, L - 1]
    return out


if __name__ == "__main__":
    # Small shapes consistent with DTW(_kernel_shape=K, _input_len=L)
    K = 8     # _kernel_shape
    L = 16    # _input_len
    B = 8     # batch

    key = jax.random.PRNGKey(0)
    k_key, x_key = jax.random.split(key)
    dtw_param = jax.random.normal(k_key, (K,), dtype=jnp.float32)
    x = jax.random.normal(x_key, (B, L), dtype=jnp.float32)

    result = jax.block_until_ready(dtw_forward(dtw_param, x))
    ref = _dtw_reference(dtw_param, x)
    np.testing.assert_allclose(np.asarray(result), ref, rtol=1e-4, atol=1e-4)

    print("KERNEL_OK")
</pallas_src>

<mosaic_0001>
module attributes {stable_mosaic.version = 11 : i64} {
  func.func @kernel(%arg0: i32, %arg1: memref<8x128xf32, #tpu.memory_space<vmem>>, %arg2: memref<16x128xf32, #tpu.memory_space<vmem>>, %arg3: memref<1x128xf32, #tpu.memory_space<vmem>>) attributes {dimension_semantics = [#tpu.dimension_semantics<parallel>], iteration_bounds = array<i64: 1>, scalar_prefetch = 0 : i64, scratch_operands = 0 : i64, tpu.core_type = #tpu.core_type<tc>, window_params = [{pipeline_mode = #tpu.pipeline_mode<synchronous>, transform_indices = @transform_0, window_bounds = array<i64: 8, 128>}, {transform_indices = @transform_1, window_bounds = array<i64: 16, 128>}, {transform_indices = @transform_2, window_bounds = array<i64: 1, 128>}]} {
    %c0 = arith.constant 0 : index
    %c0_0 = arith.constant 0 : index
    %0 = vector.load %arg1[%c0, %c0_0] : memref<8x128xf32, #tpu.memory_space<vmem>>, vector<8x128xf32>
    %1 = tpu.iota {dimensions = array<i32: 0>} : vector<8x128xi32>
    %c0_i32 = arith.constant 0 : i32
    %2 = vector.broadcast %c0_i32 : i32 to vector<8x128xi32>
    %3 = arith.cmpi eq, %1, %2 : vector<8x128xi32>
    %cst = arith.constant 1.000000e+30 : f32
    %4 = vector.broadcast %cst : f32 to vector<8x128xf32>
    %c0_1 = arith.constant 0 : index
    %c0_2 = arith.constant 0 : index
    %5 = vector.load %arg2[%c0_1, %c0_2] : memref<16x128xf32, #tpu.memory_space<vmem>>, vector<1x128xf32>
    %cst_3 = arith.constant 0.000000e+00 : f32
    %6 = vector.shape_cast %5 : vector<1x128xf32> to vector<1x128xf32>
    %7 = vector.broadcast %6 : vector<1x128xf32> to vector<8x128xf32>
    %8 = vector.broadcast %cst_3 : f32 to vector<8x128xf32>
    %9 = arith.select %3, %7, %8 : vector<8x128xi1>, vector<8x128xf32>
    %10 = arith.subf %0, %9 : vector<8x128xf32>
    %11 = arith.mulf %10, %10 : vector<8x128xf32>
    %12 = arith.select %3, %11, %4 : vector<8x128xi1>, vector<8x128xf32>
    %c1_i32 = arith.constant 1 : i32
    %c15_i32 = arith.constant 15 : i32
    %13 = arith.minsi %c1_i32, %c15_i32 : i32
    %14 = arith.index_cast %13 : i32 to index
    %c0_4 = arith.constant 0 : index
    %15 = vector.load %arg2[%14, %c0_4] : memref<16x128xf32, #tpu.memory_space<vmem>>, vector<1x128xf32>
    %c1_i32_5 = arith.constant 1 : i32
    %16 = tpu.dynamic_rotate %9 by %c1_i32_5 dim 0 : vector<8x128xf32>, i32 -> vector<8x128xf32>
    %17 = vector.shape_cast %15 : vector<1x128xf32> to vector<1x128xf32>
    %18 = vector.broadcast %17 : vector<1x128xf32> to vector<8x128xf32>
    %19 = arith.select %3, %18, %16 : vector<8x128xi1>, vector<8x128xf32>
    %20 = arith.subf %0, %19 : vector<8x128xf32>
    %21 = arith.mulf %20, %20 : vector<8x128xf32>
    %c1_i32_6 = arith.constant 1 : i32
    %22 = tpu.dynamic_rotate %12 by %c1_i32_6 dim 0 : vector<8x128xf32>, i32 -> vector<8x128xf32>
    %23 = arith.select %3, %4, %22 : vector<8x128xi1>, vector<8x128xf32>
    %24 = arith.minimumf %12, %23 : vector<8x128xf32>
    %25 = arith.minimumf %24, %4 : vector<8x128xf32>
    %26 = arith.addf %21, %25 : vector<8x128xf32>
    %c2_i32 = arith.constant 2 : i32
    %c15_i32_7 = arith.constant 15 : i32
    %27 = arith.minsi %c2_i32, %c15_i32_7 : i32
    %28 = arith.index_cast %27 : i32 to index
    %c0_8 = arith.constant 0 : index
    %29 = vector.load %arg2[%28, %c0_8] : memref<16x128xf32, #tpu.memory_space<vmem>>, vector<1x128xf32>
    %c1_i32_9 = arith.constant 1 : i32
    %30 = tpu.dynamic_rotate %19 by %c1_i32_9 dim 0 : vector<8x128xf32>, i32 -> vector<8x128xf32>
    %31 = vector.shape_cast %29 : vector<1x128xf32> to vector<1x128xf32>
    %32 = vector.broadcast %31 : vector<1x128xf32> to vector<8x128xf32>
    %33 = arith.select %3, %32, %30 : vector<8x128xi1>, vector<8x128xf32>
    %34 = arith.subf %0, %33 : vector<8x128xf32>
    %35 = arith.mulf %34, %34 : vector<8x128xf32>
    %c1_i32_10 = arith.constant 1 : i32
    %36 = tpu.dynamic_rotate %26 by %c1_i32_10 dim 0 : vector<8x128xf32>, i32 -> vector<8x128xf32>
    %37 = arith.select %3, %4, %36 : vector<8x128xi1>, vector<8x128xf32>
    %38 = arith.minimumf %26, %37 : vector<8x128xf32>
    %39 = arith.minimumf %38, %23 : vector<8x128xf32>
    %40 = arith.addf %35, %39 : vector<8x128xf32>
    %c3_i32 = arith.constant 3 : i32
    %c15_i32_11 = arith.constant 15 : i32
    %41 = arith.minsi %c3_i32, %c15_i32_11 : i32
    %42 = arith.index_cast %41 : i32 to index
    %c0_12 = arith.constant 0 : index
    %43 = vector.load %arg2[%42, %c0_12] : memref<16x128xf32, #tpu.memory_space<vmem>>, vector<1x128xf32>
    %c1_i32_13 = arith.constant 1 : i32
    %44 = tpu.dynamic_rotate %33 by %c1_i32_13 dim 0 : vector<8x128xf32>, i32 -> vector<8x128xf32>
    %45 = vector.shape_cast %43 : vector<1x128xf32> to vector<1x128xf32>
    %46 = vector.broadcast %45 : vector<1x128xf32> to vector<8x128xf32>
    %47 = arith.select %3, %46, %44 : vector<8x128xi1>, vector<8x128xf32>
    %48 = arith.subf %0, %47 : vector<8x128xf32>
    %49 = arith.mulf %48, %48 : vector<8x128xf32>
    %c1_i32_14 = arith.constant 1 : i32
    %50 = tpu.dynamic_rotate %40 by %c1_i32_14 dim 0 : vector<8x128xf32>, i32 -> vector<8x128xf32>
    %51 = arith.select %3, %4, %50 : vector<8x128xi1>, vector<8x128xf32>
    %52 = arith.minimumf %40, %51 : vector<8x128xf32>
    %53 = arith.minimumf %52, %37 : vector<8x128xf32>
    %54 = arith.addf %49, %53 : vector<8x128xf32>
    %c4_i32 = arith.constant 4 : i32
    %c15_i32_15 = arith.constant 15 : i32
    %55 = arith.minsi %c4_i32, %c15_i32_15 : i32
    %56 = arith.index_cast %55 : i32 to index
    %c0_16 = arith.constant 0 : index
    %57 = vector.load %arg2[%56, %c0_16] : memref<16x128xf32, #tpu.memory_space<vmem>>, vector<1x128xf32>
    %c1_i32_17 = arith.constant 1 : i32
    %58 = tpu.dynamic_rotate %47 by %c1_i32_17 dim 0 : vector<8x128xf32>, i32 -> vector<8x128xf32>
    %59 = vector.shape_cast %57 : vector<1x128xf32> to vector<1x128xf32>
    %60 = vector.broadcast %59 : vector<1x128xf32> to vector<8x128xf32>
    %61 = arith.select %3, %60, %58 : vector<8x128xi1>, vector<8x128xf32>
    %62 = arith.subf %0, %61 : vector<8x128xf32>
    %63 = arith.mulf %62, %62 : vector<8x128xf32>
    %c1_i32_18 = arith.constant 1 : i32
    %64 = tpu.dynamic_rotate %54 by %c1_i32_18 dim 0 : vector<8x128xf32>, i32 -> vector<8x128xf32>
    %65 = arith.select %3, %4, %64 : vector<8x128xi1>, vector<8x128xf32>
    %66 = arith.minimumf %54, %65 : vector<8x128xf32>
    %67 = arith.minimumf %66, %51 : vector<8x128xf32>
    %68 = arith.addf %63, %67 : vector<8x128xf32>
    %c5_i32 = arith.constant 5 : i32
    %c15_i32_19 = arith.constant 15 : i32
    %69 = arith.minsi %c5_i32, %c15_i32_19 : i32
    %70 = arith.index_cast %69 : i32 to index
    %c0_20 = arith.constant 0 : index
    %71 = vector.load %arg2[%70, %c0_20] : memref<16x128xf32, #tpu.memory_space<vmem>>, vector<1x128xf32>
    %c1_i32_21 = arith.constant 1 : i32
    %72 = tpu.dynamic_rotate %61 by %c1_i32_21 dim 0 : vector<8x128xf32>, i32 -> vector<8x128xf32>
    %73 = vector.shape_cast %71 : vector<1x128xf32> to vector<1x128xf32>
    %74 = vector.broadcast %73 : vector<1x128xf32> to vector<8x128xf32>
    %75 = arith.select %3, %74, %72 : vector<8x128xi1>, vector<8x128xf32>
    %76 = arith.subf %0, %75 : vector<8x128xf32>
    %77 = arith.mulf %76, %76 : vector<8x128xf32>
    %c1_i32_22 = arith.constant 1 : i32
    %78 = tpu.dynamic_rotate %68 by %c1_i32_22 dim 0 : vector<8x128xf32>, i32 -> vector<8x128xf32>
    %79 = arith.select %3, %4, %78 : vector<8x128xi1>, vector<8x128xf32>
    %80 = arith.minimumf %68, %79 : vector<8x128xf32>
    %81 = arith.minimumf %80, %65 : vector<8x128xf32>
    %82 = arith.addf %77, %81 : vector<8x128xf32>
    %c6_i32 = arith.constant 6 : i32
    %c15_i32_23 = arith.constant 15 : i32
    %83 = arith.minsi %c6_i32, %c15_i32_23 : i32
    %84 = arith.index_cast %83 : i32 to index
    %c0_24 = arith.constant 0 : index
    %85 = vector.load %arg2[%84, %c0_24] : memref<16x128xf32, #tpu.memory_space<vmem>>, vector<1x128xf32>
    %c1_i32_25 = arith.constant 1 : i32
    %86 = tpu.dynamic_rotate %75 by %c1_i32_25 dim 0 : vector<8x128xf32>, i32 -> vector<8x128xf32>
    %87 = vector.shape_cast %85 : vector<1x128xf32> to vector<1x128xf32>
    %88 = vector.broadcast %87 : vector<1x128xf32> to vector<8x128xf32>
    %89 = arith.select %3, %88, %86 : vector<8x128xi1>, vector<8x128xf32>
    %90 = arith.subf %0, %89 : vector<8x128xf32>
    %91 = arith.mulf %90, %90 : vector<8x128xf32>
    %c1_i32_26 = arith.constant 1 : i32
    %92 = tpu.dynamic_rotate %82 by %c1_i32_26 dim 0 : vector<8x128xf32>, i32 -> vector<8x128xf32>
    %93 = arith.select %3, %4, %92 : vector<8x128xi1>, vector<8x128xf32>
    %94 = arith.minimumf %82, %93 : vector<8x128xf32>
    %95 = arith.minimumf %94, %79 : vector<8x128xf32>
    %96 = arith.addf %91, %95 : vector<8x128xf32>
    %c7_i32 = arith.constant 7 : i32
    %c15_i32_27 = arith.constant 15 : i32
    %97 = arith.minsi %c7_i32, %c15_i32_27 : i32
    %98 = arith.index_cast %97 : i32 to index
    %c0_28 = arith.constant 0 : index
    %99 = vector.load %arg2[%98, %c0_28] : memref<16x128xf32, #tpu.memory_space<vmem>>, vector<1x128xf32>
    %c1_i32_29 = arith.constant 1 : i32
    %100 = tpu.dynamic_rotate %89 by %c1_i32_29 dim 0 : vector<8x128xf32>, i32 -> vector<8x128xf32>
    %101 = vector.shape_cast %99 : vector<1x128xf32> to vector<1x128xf32>
    %102 = vector.broadcast %101 : vector<1x128xf32> to vector<8x128xf32>
    %103 = arith.select %3, %102, %100 : vector<8x128xi1>, vector<8x128xf32>
    %104 = arith.subf %0, %103 : vector<8x128xf32>
    %105 = arith.mulf %104, %104 : vector<8x128xf32>
    %c1_i32_30 = arith.constant 1 : i32
    %106 = tpu.dynamic_rotate %96 by %c1_i32_30 dim 0 : vector<8x128xf32>, i32 -> vector<8x128xf32>
    %107 = arith.select %3, %4, %106 : vector<8x128xi1>, vector<8x128xf32>
    %108 = arith.minimumf %96, %107 : vector<8x128xf32>
    %109 = arith.minimumf %108, %93 : vector<8x128xf32>
    %110 = arith.addf %105, %109 : vector<8x128xf32>
    %c8_i32 = arith.constant 8 : i32
    %c15_i32_31 = arith.constant 15 : i32
    %111 = arith.minsi %c8_i32, %c15_i32_31 : i32
    %112 = arith.index_cast %111 : i32 to index
    %c0_32 = arith.constant 0 : index
    %113 = vector.load %arg2[%112, %c0_32] : memref<16x128xf32, #tpu.memory_space<vmem>>, vector<1x128xf32>
    %c1_i32_33 = arith.constant 1 : i32
    %114 = tpu.dynamic_rotate %103 by %c1_i32_33 dim 0 : vector<8x128xf32>, i32 -> vector<8x128xf32>
    %115 = vector.shape_cast %113 : vector<1x128xf32> to vector<1x128xf32>
    %116 = vector.broadcast %115 : vector<1x128xf32> to vector<8x128xf32>
    %117 = arith.select %3, %116, %114 : vector<8x128xi1>, vector<8x128xf32>
    %118 = arith.subf %0, %117 : vector<8x128xf32>
    %119 = arith.mulf %118, %118 : vector<8x128xf32>
    %c1_i32_34 = arith.constant 1 : i32
    %120 = tpu.dynamic_rotate %110 by %c1_i32_34 dim 0 : vector<8x128xf32>, i32 -> vector<8x128xf32>
    %121 = arith.select %3, %4, %120 : vector<8x128xi1>, vector<8x128xf32>
    %122 = arith.minimumf %110, %121 : vector<8x128xf32>
    %123 = arith.minimumf %122, %107 : vector<8x128xf32>
    %124 = arith.addf %119, %123 : vector<8x128xf32>
    %c9_i32 = arith.constant 9 : i32
    %c15_i32_35 = arith.constant 15 : i32
    %125 = arith.minsi %c9_i32, %c15_i32_35 : i32
    %126 = arith.index_cast %125 : i32 to index
    %c0_36 = arith.constant 0 : index
    %127 = vector.load %arg2[%126, %c0_36] : memref<16x128xf32, #tpu.memory_space<vmem>>, vector<1x128xf32>
    %c1_i32_37 = arith.constant 1 : i32
    %128 = tpu.dynamic_rotate %117 by %c1_i32_37 dim 0 : vector<8x128xf32>, i32 -> vector<8x128xf32>
    %129 = vector.shape_cast %127 : vector<1x128xf32> to vector<1x128xf32>
    %130 = vector.broadcast %129 : vector<1x128xf32> to vector<8x128xf32>
    %131 = arith.select %3, %130, %128 : vector<8x128xi1>, vector<8x128xf32>
    %132 = arith.subf %0, %131 : vector<8x128xf32>
    %133 = arith.mulf %132, %132 : vector<8x128xf32>
    %c1_i32_38 = arith.constant 1 : i32
    %134 = tpu.dynamic_rotate %124 by %c1_i32_38 dim 0 : vector<8x128xf32>, i32 -> vector<8x128xf32>
    %135 = arith.select %3, %4, %134 : vector<8x128xi1>, vector<8x128xf32>
    %136 = arith.minimumf %124, %135 : vector<8x128xf32>
    %137 = arith.minimumf %136, %121 : vector<8x128xf32>
    %138 = arith.addf %133, %137 : vector<8x128xf32>
    %c10_i32 = arith.constant 10 : i32
    %c15_i32_39 = arith.constant 15 : i32
    %139 = arith.minsi %c10_i32, %c15_i32_39 : i32
    %140 = arith.index_cast %139 : i32 to index
    %c0_40 = arith.constant 0 : index
    %141 = vector.load %arg2[%140, %c0_40] : memref<16x128xf32, #tpu.memory_space<vmem>>, vector<1x128xf32>
    %c1_i32_41 = arith.constant 1 : i32
    %142 = tpu.dynamic_rotate %131 by %c1_i32_41 dim 0 : vector<8x128xf32>, i32 -> vector<8x128xf32>
    %143 = vector.shape_cast %141 : vector<1x128xf32> to vector<1x128xf32>
    %144 = vector.broadcast %143 : vector<1x128xf32> to vector<8x128xf32>
    %145 = arith.select %3, %144, %142 : vector<8x128xi1>, vector<8x128xf32>
    %146 = arith.subf %0, %145 : vector<8x128xf32>
    %147 = arith.mulf %146, %146 : vector<8x128xf32>
    %c1_i32_42 = arith.constant 1 : i32
    %148 = tpu.dynamic_rotate %138 by %c1_i32_42 dim 0 : vector<8x128xf32>, i32 -> vector<8x128xf32>
    %149 = arith.select %3, %4, %148 : vector<8x128xi1>, vector<8x128xf32>
    %150 = arith.minimumf %138, %149 : vector<8x128xf32>
    %151 = arith.minimumf %150, %135 : vector<8x128xf32>
    %152 = arith.addf %147, %151 : vector<8x128xf32>
    %c11_i32 = arith.constant 11 : i32
    %c15_i32_43 = arith.constant 15 : i32
    %153 = arith.minsi %c11_i32, %c15_i32_43 : i32
    %154 = arith.index_cast %153 : i32 to index
    %c0_44 = arith.constant 0 : index
    %155 = vector.load %arg2[%154, %c0_44] : memref<16x128xf32, #tpu.memory_space<vmem>>, vector<1x128xf32>
    %c1_i32_45 = arith.constant 1 : i32
    %156 = tpu.dynamic_rotate %145 by %c1_i32_45 dim 0 : vector<8x128xf32>, i32 -> vector<8x128xf32>
    %157 = vector.shape_cast %155 : vector<1x128xf32> to vector<1x128xf32>
    %158 = vector.broadcast %157 : vector<1x128xf32> to vector<8x128xf32>
    %159 = arith.select %3, %158, %156 : vector<8x128xi1>, vector<8x128xf32>
    %160 = arith.subf %0, %159 : vector<8x128xf32>
    %161 = arith.mulf %160, %160 : vector<8x128xf32>
    %c1_i32_46 = arith.constant 1 : i32
    %162 = tpu.dynamic_rotate %152 by %c1_i32_46 dim 0 : vector<8x128xf32>, i32 -> vector<8x128xf32>
    %163 = arith.select %3, %4, %162 : vector<8x128xi1>, vector<8x128xf32>
    %164 = arith.minimumf %152, %163 : vector<8x128xf32>
    %165 = arith.minimumf %164, %149 : vector<8x128xf32>
    %166 = arith.addf %161, %165 : vector<8x128xf32>
    %c12_i32 = arith.constant 12 : i32
    %c15_i32_47 = arith.constant 15 : i32
    %167 = arith.minsi %c12_i32, %c15_i32_47 : i32
    %168 = arith.index_cast %167 : i32 to index
    %c0_48 = arith.constant 0 : index
    %169 = vector.load %arg2[%168, %c0_48] : memref<16x128xf32, #tpu.memory_space<vmem>>, vector<1x128xf32>
    %c1_i32_49 = arith.constant 1 : i32
    %170 = tpu.dynamic_rotate %159 by %c1_i32_49 dim 0 : vector<8x128xf32>, i32 -> vector<8x128xf32>
    %171 = vector.shape_cast %169 : vector<1x128xf32> to vector<1x128xf32>
    %172 = vector.broadcast %171 : vector<1x128xf32> to vector<8x128xf32>
    %173 = arith.select %3, %172, %170 : vector<8x128xi1>, vector<8x128xf32>
    %174 = arith.subf %0, %173 : vector<8x128xf32>
    %175 = arith.mulf %174, %174 : vector<8x128xf32>
    %c1_i32_50 = arith.constant 1 : i32
    %176 = tpu.dynamic_rotate %166 by %c1_i32_50 dim 0 : vector<8x128xf32>, i32 -> vector<8x128xf32>
    %177 = arith.select %3, %4, %176 : vector<8x128xi1>, vector<8x128xf32>
    %178 = arith.minimumf %166, %177 : vector<8x128xf32>
    %179 = arith.minimumf %178, %163 : vector<8x128xf32>
    %180 = arith.addf %175, %179 : vector<8x128xf32>
    %c13_i32 = arith.constant 13 : i32
    %c15_i32_51 = arith.constant 15 : i32
    %181 = arith.minsi %c13_i32, %c15_i32_51 : i32
    %182 = arith.index_cast %181 : i32 to index
    %c0_52 = arith.constant 0 : index
    %183 = vector.load %arg2[%182, %c0_52] : memref<16x128xf32, #tpu.memory_space<vmem>>, vector<1x128xf32>
    %c1_i32_53 = arith.constant 1 : i32
    %184 = tpu.dynamic_rotate %173 by %c1_i32_53 dim 0 : vector<8x128xf32>, i32 -> vector<8x128xf32>
    %185 = vector.shape_cast %183 : vector<1x128xf32> to vector<1x128xf32>
    %186 = vector.broadcast %185 : vector<1x128xf32> to vector<8x128xf32>
    %187 = arith.select %3, %186, %184 : vector<8x128xi1>, vector<8x128xf32>
    %188 = arith.subf %0, %187 : vector<8x128xf32>
    %189 = arith.mulf %188, %188 : vector<8x128xf32>
    %c1_i32_54 = arith.constant 1 : i32
    %190 = tpu.dynamic_rotate %180 by %c1_i32_54 dim 0 : vector<8x128xf32>, i32 -> vector<8x128xf32>
    %191 = arith.select %3, %4, %190 : vector<8x128xi1>, vector<8x128xf32>
    %192 = arith.minimumf %180, %191 : vector<8x128xf32>
    %193 = arith.minimumf %192, %177 : vector<8x128xf32>
    %194 = arith.addf %189, %193 : vector<8x128xf32>
    %c14_i32 = arith.constant 14 : i32
    %c15_i32_55 = arith.constant 15 : i32
    %195 = arith.minsi %c14_i32, %c15_i32_55 : i32
    %196 = arith.index_cast %195 : i32 to index
    %c0_56 = arith.constant 0 : index
    %197 = vector.load %arg2[%196, %c0_56] : memref<16x128xf32, #tpu.memory_space<vmem>>, vector<1x128xf32>
    %c1_i32_57 = arith.constant 1 : i32
    %198 = tpu.dynamic_rotate %187 by %c1_i32_57 dim 0 : vector<8x128xf32>, i32 -> vector<8x128xf32>
    %199 = vector.shape_cast %197 : vector<1x128xf32> to vector<1x128xf32>
    %200 = vector.broadcast %199 : vector<1x128xf32> to vector<8x128xf32>
    %201 = arith.select %3, %200, %198 : vector<8x128xi1>, vector<8x128xf32>
    %202 = arith.subf %0, %201 : vector<8x128xf32>
    %203 = arith.mulf %202, %202 : vector<8x128xf32>
    %c1_i32_58 = arith.constant 1 : i32
    %204 = tpu.dynamic_rotate %194 by %c1_i32_58 dim 0 : vector<8x128xf32>, i32 -> vector<8x128xf32>
    %205 = arith.select %3, %4, %204 : vector<8x128xi1>, vector<8x128xf32>
    %206 = arith.minimumf %194, %205 : vector<8x128xf32>
    %207 = arith.minimumf %206, %191 : vector<8x128xf32>
    %208 = arith.addf %203, %207 : vector<8x128xf32>
    %c15_i32_59 = arith.constant 15 : i32
    %c15_i32_60 = arith.constant 15 : i32
    %209 = arith.minsi %c15_i32_59, %c15_i32_60 : i32
    %210 = arith.index_cast %209 : i32 to index
    %c0_61 = arith.constant 0 : index
    %211 = vector.load %arg2[%210, %c0_61] : memref<16x128xf32, #tpu.memory_space<vmem>>, vector<1x128xf32>
    %c1_i32_62 = arith.constant 1 : i32
    %212 = tpu.dynamic_rotate %201 by %c1_i32_62 dim 0 : vector<8x128xf32>, i32 -> vector<8x128xf32>
    %213 = vector.shape_cast %211 : vector<1x128xf32> to vector<1x128xf32>
    %214 = vector.broadcast %213 : vector<1x128xf32> to vector<8x128xf32>
    %215 = arith.select %3, %214, %212 : vector<8x128xi1>, vector<8x128xf32>
    %216 = arith.subf %0, %215 : vector<8x128xf32>
    %217 = arith.mulf %216, %216 : vector<8x128xf32>
    %c1_i32_63 = arith.constant 1 : i32
    %218 = tpu.dynamic_rotate %208 by %c1_i32_63 dim 0 : vector<8x128xf32>, i32 -> vector<8x128xf32>
    %219 = arith.select %3, %4, %218 : vector<8x128xi1>, vector<8x128xf32>
    %220 = arith.minimumf %208, %219 : vector<8x128xf32>
    %221 = arith.minimumf %220, %205 : vector<8x128xf32>
    %222 = arith.addf %217, %221 : vector<8x128xf32>
    %c16_i32 = arith.constant 16 : i32
    %c15_i32_64 = arith.constant 15 : i32
    %223 = arith.minsi %c16_i32, %c15_i32_64 : i32
    %224 = arith.index_cast %223 : i32 to index
    %c0_65 = arith.constant 0 : index
    %225 = vector.load %arg2[%224, %c0_65] : memref<16x128xf32, #tpu.memory_space<vmem>>, vector<1x128xf32>
    %c1_i32_66 = arith.constant 1 : i32
    %226 = tpu.dynamic_rotate %215 by %c1_i32_66 dim 0 : vector<8x128xf32>, i32 -> vector<8x128xf32>
    %227 = vector.shape_cast %225 : vector<1x128xf32> to vector<1x128xf32>
    %228 = vector.broadcast %227 : vector<1x128xf32> to vector<8x128xf32>
    %229 = arith.select %3, %228, %226 : vector<8x128xi1>, vector<8x128xf32>
    %230 = arith.subf %0, %229 : vector<8x128xf32>
    %231 = arith.mulf %230, %230 : vector<8x128xf32>
    %c1_i32_67 = arith.constant 1 : i32
    %232 = tpu.dynamic_rotate %222 by %c1_i32_67 dim 0 : vector<8x128xf32>, i32 -> vector<8x128xf32>
    %233 = arith.select %3, %4, %232 : vector<8x128xi1>, vector<8x128xf32>
    %234 = arith.minimumf %222, %233 : vector<8x128xf32>
    %235 = arith.minimumf %234, %219 : vector<8x128xf32>
    %236 = arith.addf %231, %235 : vector<8x128xf32>
    %c17_i32 = arith.constant 17 : i32
    %c15_i32_68 = arith.constant 15 : i32
    %237 = arith.minsi %c17_i32, %c15_i32_68 : i32
    %238 = arith.index_cast %237 : i32 to index
    %c0_69 = arith.constant 0 : index
    %239 = vector.load %arg2[%238, %c0_69] : memref<16x128xf32, #tpu.memory_space<vmem>>, vector<1x128xf32>
    %c1_i32_70 = arith.constant 1 : i32
    %240 = tpu.dynamic_rotate %229 by %c1_i32_70 dim 0 : vector<8x128xf32>, i32 -> vector<8x128xf32>
    %241 = vector.shape_cast %239 : vector<1x128xf32> to vector<1x128xf32>
    %242 = vector.broadcast %241 : vector<1x128xf32> to vector<8x128xf32>
    %243 = arith.select %3, %242, %240 : vector<8x128xi1>, vector<8x128xf32>
    %244 = arith.subf %0, %243 : vector<8x128xf32>
    %245 = arith.mulf %244, %244 : vector<8x128xf32>
    %c1_i32_71 = arith.constant 1 : i32
    %246 = tpu.dynamic_rotate %236 by %c1_i32_71 dim 0 : vector<8x128xf32>, i32 -> vector<8x128xf32>
    %247 = arith.select %3, %4, %246 : vector<8x128xi1>, vector<8x128xf32>
    %248 = arith.minimumf %236, %247 : vector<8x128xf32>
    %249 = arith.minimumf %248, %233 : vector<8x128xf32>
    %250 = arith.addf %245, %249 : vector<8x128xf32>
    %c18_i32 = arith.constant 18 : i32
    %c15_i32_72 = arith.constant 15 : i32
    %251 = arith.minsi %c18_i32, %c15_i32_72 : i32
    %252 = arith.index_cast %251 : i32 to index
    %c0_73 = arith.constant 0 : index
    %253 = vector.load %arg2[%252, %c0_73] : memref<16x128xf32, #tpu.memory_space<vmem>>, vector<1x128xf32>
    %c1_i32_74 = arith.constant 1 : i32
    %254 = tpu.dynamic_rotate %243 by %c1_i32_74 dim 0 : vector<8x128xf32>, i32 -> vector<8x128xf32>
    %255 = vector.shape_cast %253 : vector<1x128xf32> to vector<1x128xf32>
    %256 = vector.broadcast %255 : vector<1x128xf32> to vector<8x128xf32>
    %257 = arith.select %3, %256, %254 : vector<8x128xi1>, vector<8x128xf32>
    %258 = arith.subf %0, %257 : vector<8x128xf32>
    %259 = arith.mulf %258, %258 : vector<8x128xf32>
    %c1_i32_75 = arith.constant 1 : i32
    %260 = tpu.dynamic_rotate %250 by %c1_i32_75 dim 0 : vector<8x128xf32>, i32 -> vector<8x128xf32>
    %261 = arith.select %3, %4, %260 : vector<8x128xi1>, vector<8x128xf32>
    %262 = arith.minimumf %250, %261 : vector<8x128xf32>
    %263 = arith.minimumf %262, %247 : vector<8x128xf32>
    %264 = arith.addf %259, %263 : vector<8x128xf32>
    %c19_i32 = arith.constant 19 : i32
    %c15_i32_76 = arith.constant 15 : i32
    %265 = arith.minsi %c19_i32, %c15_i32_76 : i32
    %266 = arith.index_cast %265 : i32 to index
    %c0_77 = arith.constant 0 : index
    %267 = vector.load %arg2[%266, %c0_77] : memref<16x128xf32, #tpu.memory_space<vmem>>, vector<1x128xf32>
    %c1_i32_78 = arith.constant 1 : i32
    %268 = tpu.dynamic_rotate %257 by %c1_i32_78 dim 0 : vector<8x128xf32>, i32 -> vector<8x128xf32>
    %269 = vector.shape_cast %267 : vector<1x128xf32> to vector<1x128xf32>
    %270 = vector.broadcast %269 : vector<1x128xf32> to vector<8x128xf32>
    %271 = arith.select %3, %270, %268 : vector<8x128xi1>, vector<8x128xf32>
    %272 = arith.subf %0, %271 : vector<8x128xf32>
    %273 = arith.mulf %272, %272 : vector<8x128xf32>
    %c1_i32_79 = arith.constant 1 : i32
    %274 = tpu.dynamic_rotate %264 by %c1_i32_79 dim 0 : vector<8x128xf32>, i32 -> vector<8x128xf32>
    %275 = arith.select %3, %4, %274 : vector<8x128xi1>, vector<8x128xf32>
    %276 = arith.minimumf %264, %275 : vector<8x128xf32>
    %277 = arith.minimumf %276, %261 : vector<8x128xf32>
    %278 = arith.addf %273, %277 : vector<8x128xf32>
    %c20_i32 = arith.constant 20 : i32
    %c15_i32_80 = arith.constant 15 : i32
    %279 = arith.minsi %c20_i32, %c15_i32_80 : i32
    %280 = arith.index_cast %279 : i32 to index
    %c0_81 = arith.constant 0 : index
    %281 = vector.load %arg2[%280, %c0_81] : memref<16x128xf32, #tpu.memory_space<vmem>>, vector<1x128xf32>
    %c1_i32_82 = arith.constant 1 : i32
    %282 = tpu.dynamic_rotate %271 by %c1_i32_82 dim 0 : vector<8x128xf32>, i32 -> vector<8x128xf32>
    %283 = vector.shape_cast %281 : vector<1x128xf32> to vector<1x128xf32>
    %284 = vector.broadcast %283 : vector<1x128xf32> to vector<8x128xf32>
    %285 = arith.select %3, %284, %282 : vector<8x128xi1>, vector<8x128xf32>
    %286 = arith.subf %0, %285 : vector<8x128xf32>
    %287 = arith.mulf %286, %286 : vector<8x128xf32>
    %c1_i32_83 = arith.constant 1 : i32
    %288 = tpu.dynamic_rotate %278 by %c1_i32_83 dim 0 : vector<8x128xf32>, i32 -> vector<8x128xf32>
    %289 = arith.select %3, %4, %288 : vector<8x128xi1>, vector<8x128xf32>
    %290 = arith.minimumf %278, %289 : vector<8x128xf32>
    %291 = arith.minimumf %290, %275 : vector<8x128xf32>
    %292 = arith.addf %287, %291 : vector<8x128xf32>
    %c21_i32 = arith.constant 21 : i32
    %c15_i32_84 = arith.constant 15 : i32
    %293 = arith.minsi %c21_i32, %c15_i32_84 : i32
    %294 = arith.index_cast %293 : i32 to index
    %c0_85 = arith.constant 0 : index
    %295 = vector.load %arg2[%294, %c0_85] : memref<16x128xf32, #tpu.memory_space<vmem>>, vector<1x128xf32>
    %c1_i32_86 = arith.constant 1 : i32
    %296 = tpu.dynamic_rotate %285 by %c1_i32_86 dim 0 : vector<8x128xf32>, i32 -> vector<8x128xf32>
    %297 = vector.shape_cast %295 : vector<1x128xf32> to vector<1x128xf32>
    %298 = vector.broadcast %297 : vector<1x128xf32> to vector<8x128xf32>
    %299 = arith.select %3, %298, %296 : vector<8x128xi1>, vector<8x128xf32>
    %300 = arith.subf %0, %299 : vector<8x128xf32>
    %301 = arith.mulf %300, %300 : vector<8x128xf32>
    %c1_i32_87 = arith.constant 1 : i32
    %302 = tpu.dynamic_rotate %292 by %c1_i32_87 dim 0 : vector<8x128xf32>, i32 -> vector<8x128xf32>
    %303 = arith.select %3, %4, %302 : vector<8x128xi1>, vector<8x128xf32>
    %304 = arith.minimumf %292, %303 : vector<8x128xf32>
    %305 = arith.minimumf %304, %289 : vector<8x128xf32>
    %306 = arith.addf %301, %305 : vector<8x128xf32>
    %c22_i32 = arith.constant 22 : i32
    %c15_i32_88 = arith.constant 15 : i32
    %307 = arith.minsi %c22_i32, %c15_i32_88 : i32
    %308 = arith.index_cast %307 : i32 to index
    %c0_89 = arith.constant 0 : index
    %309 = vector.load %arg2[%308, %c0_89] : memref<16x128xf32, #tpu.memory_space<vmem>>, vector<1x128xf32>
    %c1_i32_90 = arith.constant 1 : i32
    %310 = tpu.dynamic_rotate %299 by %c1_i32_90 dim 0 : vector<8x128xf32>, i32 -> vector<8x128xf32>
    %311 = vector.shape_cast %309 : vector<1x128xf32> to vector<1x128xf32>
    %312 = vector.broadcast %311 : vector<1x128xf32> to vector<8x128xf32>
    %313 = arith.select %3, %312, %310 : vector<8x128xi1>, vector<8x128xf32>
    %314 = arith.subf %0, %313 : vector<8x128xf32>
    %315 = arith.mulf %314, %314 : vector<8x128xf32>
    %c1_i32_91 = arith.constant 1 : i32
    %316 = tpu.dynamic_rotate %306 by %c1_i32_91 dim 0 : vector<8x128xf32>, i32 -> vector<8x128xf32>
    %317 = arith.select %3, %4, %316 : vector<8x128xi1>, vector<8x128xf32>
    %318 = arith.minimumf %306, %317 : vector<8x128xf32>
    %319 = arith.minimumf %318, %303 : vector<8x128xf32>
    %320 = arith.addf %315, %319 : vector<8x128xf32>
    %c22_i32_92 = arith.constant 22 : i32
    %c7_i32_93 = arith.constant 7 : i32
    %321 = vector.broadcast %c7_i32_93 : i32 to vector<8x128xi32>
    %322 = arith.cmpi eq, %1, %321 : vector<8x128xi32>
    %cst_94 = arith.constant 0.000000e+00 : f32
    %323 = vector.broadcast %cst_94 : f32 to vector<8x128xf32>
    %324 = arith.select %322, %320, %323 : vector<8x128xi1>, vector<8x128xf32>
    %cst_95 = arith.constant dense<0.000000e+00> : vector<128xf32>
    %325 = vector.multi_reduction <add>, %324, %cst_95 [0] : vector<8x128xf32> to vector<128xf32>
    %326 = vector.shape_cast %325 : vector<128xf32> to vector<1x128xf32>
    %c0_96 = arith.constant 0 : index
    %c0_97 = arith.constant 0 : index
    %327 = vector.load %arg3[%c0_96, %c0_97] : memref<1x128xf32, #tpu.memory_space<vmem>>, vector<1x128xf32>
    tpu.vector_store %arg3[%c0_96, %c0_97], %326 {strides = array<i32>} : memref<1x128xf32, #tpu.memory_space<vmem>>, vector<1x128xf32>,
    return
  }
  func.func @transform_0(%arg0: i32) -> (i32, i32) {
    %c0_i32 = arith.constant 0 : i32
    %c0_i32_0 = arith.constant 0 : i32
    %c0_i32_1 = arith.constant 0 : i32
    return %c0_i32, %c0_i32_0 : i32, i32
  }
  func.func @transform_1(%arg0: i32) -> (i32, i32) {
    %c0_i32 = arith.constant 0 : i32
    %c0_i32_0 = arith.constant 0 : i32
    return %c0_i32, %arg0 : i32, i32
  }
  func.func @transform_2(%arg0: i32) -> (i32, i32) {
    %c0_i32 = arith.constant 0 : i32
    %c0_i32_0 = arith.constant 0 : i32
    return %c0_i32, %arg0 : i32, i32
  }
}

</mosaic_0001>

<bundles_post_ra>
// kernel: tpu_custom_call.1
= control target key start
LH: loop header
LB: loop body
LE: loop exit
PB: predicated region body
PF: predicated region fallthrough
CT: control target
= control target key end

     0   :  { %7 = vsyncpa [#allocation3], 0  ;;  %s566_s0 = inlined_call_operand.hbm [shape: f32[8,128], index: 0, kind: input, shape index: {}]   ;;  %s567_s1 = inlined_call_operand.hbm [shape: f32[16,128], index: 1, kind: input, shape index: {}]   ;;  %s568_s2 = inlined_call_operand.hbm [shape: f32[1,128], index: 2, kind: output, shape index: {}]  }
   0x1   :  { %8 = vsyncpa [#allocation6], 0 }
   0x2   :  { %9 = vsyncpa [#allocation4], 0  ;;  %s15_s11 = sshll.u32 %s566_s0, 4  ;;  %s406_s12 = smov [#allocation2]   ;;  %s16_s11 = int_to_ptr.hbm [resolvable:$true] %s15_s11 }
   0x3   :  { %s17_s13 = sshll.u32 %s406_s12, 4  ;;  %s25_s16 = sshll.u32 %s567_s1, 4  ;;  %s18_s13 = int_to_ptr.vmem [resolvable:$true] %s17_s13  ;;  %s26_s16 = int_to_ptr.hbm [resolvable:$true] %s25_s16 }
   0x4   :  { %20 = dma.hbm_to_vmem [thread:$0]  %s16_s11, 128, %s18_s13, [#allocation3]  }
   0x5   :  { %s407_s17 = smov [#allocation5]   ;;  %s408_s19 = smov 128  }
   0x6   :  { %s27_s18 = sshll.u32 %s407_s17, 4  ;;  %s409_s20 = smov 8   ;;  %s28_s18 = int_to_ptr.vmem [resolvable:$true] %s27_s18 }
   0x7   :  { %33 = dma.hbm_to_vmem [thread:$0]  %s26_s16, 256, %s28_s18, [#allocation6], %s408_s19, %s408_s19, %s409_s20  }
   0x8   :  { %400 = dma.done.wait [#allocation3], 128  }
   0x9   :  { %401 = vsyncadd [#allocation3], 4294967168 }
   0xa   :  { %402 = dma.done.wait [#allocation6], 256  }
   0xb   :  { %403 = vsyncadd [#allocation6], 4294967040  ;;  %v43_v0 = vlaneseq  ;;  %v435_v2 = vld [vmem:[#allocation2] sm:$0xff]  ;;  %v312_v3 = vld [vmem:[#allocation5] ss:$0 sm:$0xff]  ;;  %s410_s0 = smov [#allocation7]  }
   0xc   :  { %v313_v4 = vld [vmem:[#allocation5 + $0x1] ss:$0 sm:$0xff]  ;;  %v314_v14 = vld [vmem:[#allocation5 + $0x2] ss:$0 sm:$0xff]  ;;  %v315_v24 = vld [vmem:[#allocation5 + $0x3] ss:$0 sm:$0xff] }
   0xd   :  { %v432_v1 = vshrl.u32 %v43_v0, 7  ;;  %v316_v34 = vld [vmem:[#allocation5 + $0x4] ss:$0 sm:$0xff]  ;;  %v317_v44 = vld [vmem:[#allocation5 + $0x5] ss:$0 sm:$0xff]  ;;  %s294_s1 = sshll.u32 %s410_s0, 4  ;;  %s295_s1 = int_to_ptr.vmem [resolvable:$true] %s294_s1 }
   0xe   :  { %v318_v54 = vld [vmem:[#allocation5 + $0x6] ss:$0 sm:$0xff]  ;;  %v319_v0 = vld [vmem:[#allocation5 + $0x7] ss:$0 sm:$0xff]  ;;  %s296_s23 = sshll.u32 %s568_s2, 4  ;;  %s297_s23 = int_to_ptr.hbm [resolvable:$true] %s296_s23 }
   0xf   :  { %vm45_vm0 = vcmp.eq.s32.totalorder %v432_v1, 0  ;;  %vm280_vm1 = vcmp.eq.s32.totalorder %v432_v1, 7 }
  0x10   :  { %v48_v5 = vsel %vm45_vm0, %v312_v3, 0.0 }
  0x11   :  { %v49_v6 = vsub.f32 %v435_v2, %v48_v5  ;;  %v53_v7 = vrot.slane %v48_v5, 7 }
  0x13   :  { %v50_v8 = vmul.f32 %v49_v6, %v49_v6  ;;  %v55_v9 = vsel %vm45_vm0, %v313_v4, %v53_v7 }
  0x14   :  { %v56_v11 = vsub.f32 %v435_v2, %v55_v9  ;;  %v64_v13 = vrot.slane %v55_v9, 7 }
  0x15   :  { %v51_v10 = vsel %vm45_vm0, %v50_v8, 1e+30 }
  0x16   :  { %v58_v12 = vrot.slane %v51_v10, 7  ;;  %v57_v16 = vmul.f32 %v56_v11, %v56_v11  ;;  %v66_v19 = vsel %vm45_vm0, %v314_v14, %v64_v13 }
  0x17   :  { %v67_v21 = vsub.f32 %v435_v2, %v66_v19  ;;  %v75_v23 = vrot.slane %v66_v19, 7 }
  0x18   :  { %v59_v15 = vsel %vm45_vm0, 1e+30, %v58_v12  ;;  %v320_v12 = vld [vmem:[#allocation5 + $0x8] ss:$0 sm:$0xff] }
  0x19   :  { %v60_v17 = vmin.f32 %v51_v10, %v59_v15  ;;  %v68_v26 = vmul.f32 %v67_v21, %v67_v21  ;;  %v77_v29 = vsel %vm45_vm0, %v315_v24, %v75_v23 }
  0x1a   :  { %v78_v31 = vsub.f32 %v435_v2, %v77_v29  ;;  %v86_v33 = vrot.slane %v77_v29, 7 }
  0x1b   :  { %v61_v18 = vmin.f32 %v60_v17, 1e+30 }
  0x1c   :  { %v79_v36 = vmul.f32 %v78_v31, %v78_v31  ;;  %v88_v39 = vsel %vm45_vm0, %v316_v34, %v86_v33 }
  0x1d   :  { %v62_v20 = vadd.f32 %v61_v18, %v57_v16  ;;  %v89_v41 = vsub.f32 %v435_v2, %v88_v39  ;;  %v97_v43 = vrot.slane %v88_v39, 7 }
  0x1f   :  { %v69_v22 = vrot.slane %v62_v20, 7  ;;  %v90_v46 = vmul.f32 %v89_v41, %v89_v41  ;;  %v99_v49 = vsel %vm45_vm0, %v317_v44, %v97_v43 }
  0x20   :  { %v100_v51 = vsub.f32 %v435_v2, %v99_v49  ;;  %v108_v53 = vrot.slane %v99_v49, 7 }
  0x21   :  { %v70_v25 = vsel %vm45_vm0, 1e+30, %v69_v22  ;;  %v321_v22 = vld [vmem:[#allocation5 + $0x9] ss:$0 sm:$0xff] }
  0x22   :  { %v71_v27 = vmin.f32 %v62_v20, %v70_v25  ;;  %v101_v56 = vmul.f32 %v100_v51, %v100_v51  ;;  %v110_v59 = vsel %vm45_vm0, %v318_v54, %v108_v53 }
  0x23   :  { %v111_v61 = vsub.f32 %v435_v2, %v110_v59  ;;  %v119_v63 = vrot.slane %v110_v59, 7 }
  0x24   :  { %v72_v28 = vmin.f32 %v71_v27, %v59_v15 }
  0x25   :  { %v112_v4 = vmul.f32 %v111_v61, %v111_v61  ;;  %v121_v7 = vsel %vm45_vm0, %v319_v0, %v119_v63 }
  0x26   :  { %v73_v30 = vadd.f32 %v72_v28, %v68_v26  ;;  %v122_v9 = vsub.f32 %v435_v2, %v121_v7  ;;  %v130_v11 = vrot.slane %v121_v7, 7 }
  0x28   :  { %v80_v32 = vrot.slane %v73_v30, 7  ;;  %v123_v14 = vmul.f32 %v122_v9, %v122_v9  ;;  %v132_v17 = vsel %vm45_vm0, %v320_v12, %v130_v11 }
  0x29   :  { %v133_v19 = vsub.f32 %v435_v2, %v132_v17  ;;  %v141_v21 = vrot.slane %v132_v17, 7 }
  0x2a   :  { %v81_v35 = vsel %vm45_vm0, 1e+30, %v80_v32  ;;  %v322_v32 = vld [vmem:[#allocation5 + $0xa] ss:$0 sm:$0xff] }
  0x2b   :  { %v82_v37 = vmin.f32 %v73_v30, %v81_v35  ;;  %v134_v24 = vmul.f32 %v133_v19, %v133_v19  ;;  %v143_v27 = vsel %vm45_vm0, %v321_v22, %v141_v21 }
  0x2c   :  { %v144_v29 = vsub.f32 %v435_v2, %v143_v27  ;;  %v152_v31 = vrot.slane %v143_v27, 7 }
  0x2d   :  { %v83_v38 = vmin.f32 %v82_v37, %v70_v25 }
  0x2e   :  { %v145_v34 = vmul.f32 %v144_v29, %v144_v29  ;;  %v154_v37 = vsel %vm45_vm0, %v322_v32, %v152_v31 }
  0x2f   :  { %v84_v40 = vadd.f32 %v83_v38, %v79_v36  ;;  %v155_v39 = vsub.f32 %v435_v2, %v154_v37  ;;  %v163_v41 = vrot.slane %v154_v37, 7 }
  0x31   :  { %v91_v42 = vrot.slane %v84_v40, 7  ;;  %v156_v44 = vmul.f32 %v155_v39, %v155_v39 }
  0x33   :  { %v92_v45 = vsel %vm45_vm0, 1e+30, %v91_v42  ;;  %v323_v42 = vld [vmem:[#allocation5 + $0xb] ss:$0 sm:$0xff] }
  0x34   :  { %v93_v47 = vmin.f32 %v84_v40, %v92_v45 }
  0x36   :  { %v94_v48 = vmin.f32 %v93_v47, %v81_v35  ;;  %v165_v47 = vsel %vm45_vm0, %v323_v42, %v163_v41 }
  0x37   :  { %v166_v49 = vsub.f32 %v435_v2, %v165_v47  ;;  %v174_v51 = vrot.slane %v165_v47, 7 }
  0x38   :  { %v95_v50 = vadd.f32 %v94_v48, %v90_v46 }
  0x39   :  { %v167_v54 = vmul.f32 %v166_v49, %v166_v49 }
  0x3a   :  { %v102_v52 = vrot.slane %v95_v50, 7 }
  0x3c   :  { %v103_v55 = vsel %vm45_vm0, 1e+30, %v102_v52  ;;  %v324_v52 = vld [vmem:[#allocation5 + $0xc] ss:$0 sm:$0xff] }
  0x3d   :  { %v104_v57 = vmin.f32 %v95_v50, %v103_v55 }
  0x3f   :  { %v105_v58 = vmin.f32 %v104_v57, %v92_v45  ;;  %v176_v57 = vsel %vm45_vm0, %v324_v52, %v174_v51 }
  0x40   :  { %v177_v59 = vsub.f32 %v435_v2, %v176_v57  ;;  %v185_v61 = vrot.slane %v176_v57, 7 }
  0x41   :  { %v106_v60 = vadd.f32 %v105_v58, %v101_v56 }
  0x42   :  { %v178_v0 = vmul.f32 %v177_v59, %v177_v59 }
  0x43   :  { %v113_v62 = vrot.slane %v106_v60, 7 }
  0x45   :  { %v114_v3 = vsel %vm45_vm0, 1e+30, %v113_v62  ;;  %v325_v62 = vld [vmem:[#allocation5 + $0xd] ss:$0 sm:$0xff] }
  0x46   :  { %v115_v5 = vmin.f32 %v106_v60, %v114_v3 }
  0x48   :  { %v116_v6 = vmin.f32 %v115_v5, %v103_v55  ;;  %v187_v5 = vsel %vm45_vm0, %v325_v62, %v185_v61 }
  0x49   :  { %v188_v7 = vsub.f32 %v435_v2, %v187_v5  ;;  %v196_v9 = vrot.slane %v187_v5, 7 }
  0x4a   :  { %v117_v8 = vadd.f32 %v116_v6, %v112_v4 }
  0x4b   :  { %v189_v12 = vmul.f32 %v188_v7, %v188_v7 }
  0x4c   :  { %v124_v10 = vrot.slane %v117_v8, 7 }
  0x4e   :  { %v125_v13 = vsel %vm45_vm0, 1e+30, %v124_v10  ;;  %v326_v10 = vld [vmem:[#allocation5 + $0xe] ss:$0 sm:$0xff] }
  0x4f   :  { %v126_v15 = vmin.f32 %v117_v8, %v125_v13 }
  0x51   :  { %v127_v16 = vmin.f32 %v126_v15, %v114_v3  ;;  %v198_v15 = vsel %vm45_vm0, %v326_v10, %v196_v9 }
  0x52   :  { %v199_v17 = vsub.f32 %v435_v2, %v198_v15  ;;  %v207_v19 = vrot.slane %v198_v15, 7 }
  0x53   :  { %v128_v18 = vadd.f32 %v127_v16, %v123_v14 }
  0x54   :  { %v200_v22 = vmul.f32 %v199_v17, %v199_v17 }
  0x55   :  { %v135_v20 = vrot.slane %v128_v18, 7 }
  0x57   :  { %v136_v23 = vsel %vm45_vm0, 1e+30, %v135_v20  ;;  %v510_v20 = vld [vmem:[#allocation5 + $0xf] ss:$0 sm:$0xff] }
  0x58   :  { %v137_v25 = vmin.f32 %v128_v18, %v136_v23 }
  0x5a   :  { %v138_v26 = vmin.f32 %v137_v25, %v125_v13  ;;  %v209_v25 = vsel %vm45_vm0, %v510_v20, %v207_v19 }
  0x5b   :  { %v210_v27 = vsub.f32 %v435_v2, %v209_v25  ;;  %v217_v29 = vrot.slane %v209_v25, 7 }
  0x5c   :  { %v139_v28 = vadd.f32 %v138_v26, %v134_v24 }
  0x5d   :  { %v211_v31 = vmul.f32 %v210_v27, %v210_v27 }
  0x5e   :  { %v146_v30 = vrot.slane %v139_v28, 7 }
  0x60   :  { %v147_v33 = vsel %vm45_vm0, 1e+30, %v146_v30 }
  0x61   :  { %v148_v35 = vmin.f32 %v139_v28, %v147_v33 }
  0x63   :  { %v149_v36 = vmin.f32 %v148_v35, %v136_v23 }
  0x65   :  { %v150_v38 = vadd.f32 %v149_v36, %v145_v34  ;;  %v218_v34 = vsel %vm45_vm0, %v510_v20, %v217_v29 }
  0x66   :  { %v219_v36 = vsub.f32 %v435_v2, %v218_v34 }
  0x67   :  { %v157_v40 = vrot.slane %v150_v38, 7 }
  0x69   :  { %v158_v43 = vsel %vm45_vm0, 1e+30, %v157_v40  ;;  %v220_v40 = vmul.f32 %v219_v36, %v219_v36 }
  0x6a   :  { %v159_v45 = vmin.f32 %v150_v38, %v158_v43  ;;  %v226_v38 = vrot.slane %v218_v34, 7 }
  0x6c   :  { %v160_v46 = vmin.f32 %v159_v45, %v147_v33 }
  0x6e   :  { %v161_v48 = vadd.f32 %v160_v46, %v156_v44 }
  0x70   :  { %v168_v50 = vrot.slane %v161_v48, 7 }
  0x72   :  { %v169_v53 = vsel %vm45_vm0, 1e+30, %v168_v50 }
  0x73   :  { %v170_v55 = vmin.f32 %v161_v48, %v169_v53 }
  0x75   :  { %v171_v56 = vmin.f32 %v170_v55, %v158_v43  ;;  %v227_v43 = vsel %vm45_vm0, %v510_v20, %v226_v38 }
  0x76   :  { %v228_v45 = vsub.f32 %v435_v2, %v227_v43  ;;  %v235_v47 = vrot.slane %v227_v43, 7 }
  0x77   :  { %v172_v58 = vadd.f32 %v171_v56, %v167_v54 }
  0x78   :  { %v229_v49 = vmul.f32 %v228_v45, %v228_v45  ;;  %v236_v52 = vsel %vm45_vm0, %v510_v20, %v235_v47 }
  0x79   :  { %v179_v60 = vrot.slane %v172_v58, 7  ;;  %v237_v54 = vsub.f32 %v435_v2, %v236_v52  ;;  %v244_v56 = vrot.slane %v236_v52, 7 }
  0x7b   :  { %v180_v63 = vsel %vm45_vm0, 1e+30, %v179_v60  ;;  %v245_v61 = vsel %vm45_vm0, %v510_v20, %v244_v56 }
  0x7c   :  { %v181_v3 = vmin.f32 %v172_v58, %v180_v63  ;;  %v238_v58 = vmul.f32 %v237_v54, %v237_v54 }
  0x7e   :  { %v182_v4 = vmin.f32 %v181_v3, %v169_v53  ;;  %v253_v3 = vrot.slane %v245_v61, 7 }
  0x80   :  { %v183_v6 = vadd.f32 %v182_v4, %v178_v0 }
  0x82   :  { %v190_v8 = vrot.slane %v183_v6, 7 }
  0x84   :  { %v191_v11 = vsel %vm45_vm0, 1e+30, %v190_v8  ;;  %v254_v8 = vsel %vm45_vm0, %v510_v20, %v253_v3 }
  0x85   :  { %v192_v13 = vmin.f32 %v183_v6, %v191_v11  ;;  %v255_v10 = vsub.f32 %v435_v2, %v254_v8 }
  0x87   :  { %v193_v14 = vmin.f32 %v192_v13, %v180_v63  ;;  %v246_v63 = vsub.f32 %v435_v2, %v245_v61 }
  0x89   :  { %v194_v16 = vadd.f32 %v193_v14, %v189_v12  ;;  %v247_v5 = vmul.f32 %v246_v63, %v246_v63  ;;  %v262_v12 = vrot.slane %v254_v8, 7  ;;  %v256_v14 = vmul.f32 %v255_v10, %v255_v10 }
  0x8b   :  { %v201_v18 = vrot.slane %v194_v16, 7  ;;  %v263_v17 = vsel %vm45_vm0, %v510_v20, %v262_v12 }
  0x8c   :  { %v264_v19 = vsub.f32 %v435_v2, %v263_v17 }
  0x8d   :  { %v202_v21 = vsel %vm45_vm0, 1e+30, %v201_v18 }
  0x8e   :  { %v203_v23 = vmin.f32 %v194_v16, %v202_v21 }
  0x90   :  { %v204_v24 = vmin.f32 %v203_v23, %v191_v11 }
  0x92   :  { %v205_v26 = vadd.f32 %v204_v24, %v200_v22  ;;  %v271_v22 = vrot.slane %v263_v17, 7  ;;  %v265_v24 = vmul.f32 %v264_v19, %v264_v19 }
  0x94   :  { %v212_v28 = vrot.slane %v205_v26, 7  ;;  %v272_v27 = vsel %vm45_vm0, %v510_v20, %v271_v22 }
  0x95   :  { %v273_v29 = vsub.f32 %v435_v2, %v272_v27 }
  0x96   :  { %v213_v30 = vsel %vm45_vm0, 1e+30, %v212_v28 }
  0x97   :  { %v214_v32 = vmin.f32 %v205_v26, %v213_v30 }
  0x99   :  { %v215_v33 = vmin.f32 %v214_v32, %v202_v21  ;;  %v274_v32 = vmul.f32 %v273_v29, %v273_v29 }
  0x9b   :  { %v216_v35 = vadd.f32 %v215_v33, %v211_v31 }
  0x9d   :  { %v221_v37 = vrot.slane %v216_v35, 7 }
  0x9f   :  { %v222_v39 = vsel %vm45_vm0, 1e+30, %v221_v37 }
  0xa0   :  { %v223_v41 = vmin.f32 %v216_v35, %v222_v39 }
  0xa2   :  { %v224_v42 = vmin.f32 %v223_v41, %v213_v30 }
  0xa4   :  { %v225_v44 = vadd.f32 %v224_v42, %v220_v40 }
  0xa6   :  { %v230_v46 = vrot.slane %v225_v44, 7 }
  0xa8   :  { %v231_v48 = vsel %vm45_vm0, 1e+30, %v230_v46 }
  0xa9   :  { %v232_v50 = vmin.f32 %v225_v44, %v231_v48 }
  0xab   :  { %v233_v51 = vmin.f32 %v232_v50, %v222_v39 }
  0xad   :  { %v234_v53 = vadd.f32 %v233_v51, %v229_v49 }
  0xaf   :  { %v239_v55 = vrot.slane %v234_v53, 7 }
  0xb1   :  { %v240_v57 = vsel %vm45_vm0, 1e+30, %v239_v55 }
  0xb2   :  { %v241_v59 = vmin.f32 %v234_v53, %v240_v57 }
  0xb4   :  { %v242_v60 = vmin.f32 %v241_v59, %v231_v48 }
  0xb6   :  { %v243_v62 = vadd.f32 %v242_v60, %v238_v58 }
  0xb8   :  { %v248_v0 = vrot.slane %v243_v62, 7 }
  0xba   :  { %v249_v4 = vsel %vm45_vm0, 1e+30, %v248_v0 }
  0xbb   :  { %v250_v6 = vmin.f32 %v243_v62, %v249_v4 }
  0xbd   :  { %v251_v7 = vmin.f32 %v250_v6, %v240_v57 }
  0xbf   :  { %v252_v9 = vadd.f32 %v251_v7, %v247_v5 }
  0xc1   :  { %v257_v11 = vrot.slane %v252_v9, 7 }
  0xc3   :  { %v258_v13 = vsel %vm45_vm0, 1e+30, %v257_v11 }
  0xc4   :  { %v259_v15 = vmin.f32 %v252_v9, %v258_v13 }
  0xc6   :  { %v260_v16 = vmin.f32 %v259_v15, %v249_v4 }
  0xc8   :  { %v261_v18 = vadd.f32 %v260_v16, %v256_v14 }
  0xca   :  { %v266_v21 = vrot.slane %v261_v18, 7 }
  0xcc   :  { %v267_v23 = vsel %vm45_vm0, 1e+30, %v266_v21 }
  0xcd   :  { %v268_v25 = vmin.f32 %v261_v18, %v267_v23 }
  0xcf   :  { %v269_v26 = vmin.f32 %v268_v25, %v258_v13 }
  0xd1   :  { %v270_v28 = vadd.f32 %v269_v26, %v265_v24 }
  0xd3   :  { %v275_v30 = vrot.slane %v270_v28, 7 }
  0xd5   :  { %v276_v31 = vsel %vm45_vm0, 1e+30, %v275_v30 }
  0xd6   :  { %v277_v33 = vmin.f32 %v270_v28, %v276_v31 }
  0xd8   :  { %v278_v34 = vmin.f32 %v277_v33, %v267_v23 }
  0xda   :  { %v279_v35 = vadd.f32 %v278_v34, %v274_v32 }
  0xdc   :  { %v281_v36 = vsel %vm280_vm1, %v279_v35, 0.0 }
  0xdd   :  { %v282_v37 = vrot.slane %v281_v36, 4 }
  0xdf   :  { %v283_v38 = vadd.f32 %v282_v37, %v281_v36 }
  0xe1   :  { %v284_v39 = vrot.slane %v283_v38, 2 }
  0xe3   :  { %v285_v40 = vadd.f32 %v284_v39, %v283_v38 }
  0xe5   :  { %v286_v2 = vrot.slane %v285_v40, 1 }
  0xe7   :  { %v287_v20 = vadd.f32 %v286_v2, %v285_v40 }
  0xe9   :  { %288 = vst [vmem:[#allocation7] sm:$0x1] %v287_v20 }
  0xea   :  { %299 = dma.vmem_to_hbm [thread:$0]  %s295_s1, 16, %s297_s23, [#allocation4]  }
  0xeb   :  { %404 = dma.done.wait [#allocation4], 16  }
  0xec   :  { %405 = vsyncadd [#allocation4], 4294967280 }
  0xed   :  { %304 = vsyncpa [#allocation3], 1 }
  0xee   :  { %305 = vsyncpa [#allocation6], 1 }
  0xef   :  { %306 = vsyncpa [#allocation4], 1 }

</bundles_post_ra>
